<compile_context>
chip_gen: v6e
topology: v6e:2x2x1
jax: 0.10.0
libtpu: 0.0.40
codegen_flags: <defaults>
</compile_context>

<pallas_src>
import functools

import numpy as np
import jax
import jax.numpy as jnp
from jax.experimental import pallas as pl
from jax.experimental.pallas import tpu as pltpu

LEAK = 0.01          # PyTorch LeakyReLU default negative_slope
_LANE = 128


def _leaky(v):
    return jnp.where(v > 0, v, LEAK * v)


def _round_up(x, m):
    return ((x + m - 1) // m) * m


# ---------------------------------------------------------------------------
# TPU-generation awareness (best effort, conservative fallback).
# ---------------------------------------------------------------------------
def _vmem_capacity_bytes():
    try:
        return int(pltpu.get_tpu_info().vmem_capacity_bytes)
    except Exception:
        return 64 * 1024 * 1024            # conservative: v7x per-TensorCore


_SPLIT_THRESHOLD_ROWS = 128                # below this, one block (no grid split)


def _select_row_tile(m_rows):
    """>=2 parallel tiles for mid/large batches (keeps both v7x TCs busy),
    capped per VMEM generation (2048 rows on 128-MiB chips, 1024 on v7x)."""
    vmem = _vmem_capacity_bytes()
    cap = 2048 if vmem >= 96 * 1024 * 1024 else 1024
    if m_rows <= _SPLIT_THRESHOLD_ROWS:
        return m_rows
    return max(8, min(cap, _round_up(pl.cdiv(m_rows, 2), 8)))


@functools.lru_cache(maxsize=None)
def _weight_pipeline_mode():
    """pl.Buffered(1) for constant-index weight/bias blocks (halves their VMEM
    footprint).  Probed once with a tiny pallas_call; returns None (and the
    caller falls back to default buffering) if this build rejects it."""
    try:
        mode = pl.Buffered(1)

        def _probe(x_ref, w_ref, o_ref):
            o_ref[...] = x_ref[...] + w_ref[...]

        out = pl.pallas_call(
            _probe,
            out_shape=jax.ShapeDtypeStruct((8, 128), jnp.float32),
            grid=(2,),
            in_specs=[pl.BlockSpec((8, 128), lambda i: (0, 0)),
                      pl.BlockSpec((8, 128), lambda i: (0, 0),
                                   pipeline_mode=mode)],
            out_specs=pl.BlockSpec((8, 128), lambda i: (0, 0)),
        )(jnp.ones((8, 128), jnp.float32),
          jnp.full((8, 128), 2.0, jnp.float32))
        if not np.allclose(np.asarray(jax.block_until_ready(out)), 3.0):
            return None
        return mode
    except Exception:
        return None


# ---------------------------------------------------------------------------
# Fused (Linear [+ LeakyReLU])^n Pallas kernel.  refs: (x, w1, b1, ..., wn, bn, out)
# ---------------------------------------------------------------------------
def _make_fused_mlp_kernel(n_layers, final_act):
    def kernel(*refs):
        x_ref, out_ref = refs[0], refs[-1]
        h = x_ref[...].astype(jnp.float32)
        for i in range(n_layers):
            w = refs[1 + 2 * i][...]
            b = refs[2 + 2 * i][...].astype(jnp.float32)
            # Activations are cast to the (pre-cast) weight dtype for the MXU;
            # accumulation is always f32.
            h = jnp.dot(h.astype(w.dtype), w,
                        preferred_element_type=jnp.float32) + b
            if i < n_layers - 1 or final_act:
                h = _leaky(h)
        out_ref[...] = h.astype(out_ref.dtype)

    return kernel


def fused_mlp_pallas(x, weights, biases, *, final_act=False, row_tile=None,
                     out_features=None):
    """y = chain of (Linear [+ LeakyReLU]) fully fused in ONE pallas_call.

    weights[i]: (d_in, d_out)   biases[i]: (1, d_out)  (pre-padded, see
    pad_linear_chain).  The padded, lane-dense output is sliced back to
    `out_features` columns in this wrapper.
    """
    M, in_dim = x.shape
    out_pad = weights[-1].shape[1]
    if out_features is None:
        out_features = out_pad

    if row_tile is None:
        row_tile = _select_row_tile(M)
    row_tile = max(1, min(row_tile, M))
    grid = (pl.cdiv(M, row_tile),)   # ragged last tile handled by Pallas masking

    wmode = _weight_pipeline_mode()

    def _const_spec(shape):
        if wmode is not None:
            return pl.BlockSpec(shape, lambda i: (0, 0), pipeline_mode=wmode)
        return pl.BlockSpec(shape, lambda i: (0, 0))

    in_specs = [pl.BlockSpec((row_tile, in_dim), lambda i: (i, 0))]
    args = [x]
    for w, b in zip(weights, biases):
        in_specs.append(_const_spec(w.shape))
        in_specs.append(_const_spec(b.shape))
        args += [w, b]
    out_spec = pl.BlockSpec((row_tile, out_pad), lambda i: (i, 0))

    vmem = _vmem_capacity_bytes()
    vmem_limit = int(min(vmem // 2, 64 * 1024 * 1024))

    kernel = _make_fused_mlp_kernel(len(weights), final_act)
    y = pl.pallas_call(
        kernel,
        out_shape=jax.ShapeDtypeStruct((M, out_pad), jnp.float32),
        grid=grid,
        in_specs=in_specs,
        out_specs=out_spec,
        compiler_params=pltpu.CompilerParams(
            dimension_semantics=("parallel",),
            vmem_limit_bytes=vmem_limit),
    )(*args)
    if out_features != out_pad:
        y = y[:, :out_features]
    return y


# ---------------------------------------------------------------------------
# Lane/sublane padding of a Linear chain (zero-pad -> numerics unchanged).
# ---------------------------------------------------------------------------
def pad_linear_chain(weights, biases, lane_multiple=_LANE,
                     weight_dtype=jnp.float32):
    """Zero-pad chained Linear layers so EVERY width (including the final
    output) is a multiple of `lane_multiple` -> lane-dense vregs and unmasked
    stores.  The true input width is kept.  Weights are cast ONCE to
    `weight_dtype` (e.g. bf16); biases stay f32."""
    out_w, out_b = [], []
    k_pad = weights[0].shape[0]          # keep true input width
    for w, b in zip(weights, biases):
        k, nout = w.shape
        n_pad = _round_up(nout, lane_multiple)
        w_p = jnp.zeros((k_pad, n_pad), jnp.float32).at[:k, :nout].set(w)
        b_p = jnp.zeros((1, n_pad), jnp.float32).at[:, :nout].set(b)
        out_w.append(w_p.astype(weight_dtype))
        out_b.append(b_p)
        k_pad = n_pad
    return out_w, out_b


# ---------------------------------------------------------------------------
# Conv -> dense matrix (parameter-setup time only; the data-path conv runs
# inside the fused Pallas kernel as a matmul).
# ---------------------------------------------------------------------------
def conv_as_matrix(w_torch, h_in, w_in, padding, out_order="hwc"):
    """Stride-1 Conv2d as a dense matrix on HWC-flattened per-sample vectors.
    Built by probing the (linear) conv with a one-hot basis.
    out_order='chw' reproduces torch Flatten() on the NCHW conv output."""
    cout, cin, kh, kw = w_torch.shape
    d_in = h_in * w_in * cin
    basis = jnp.eye(d_in, dtype=jnp.float32).reshape(d_in, h_in, w_in, cin)
    w_hwio = jnp.transpose(w_torch, (2, 3, 1, 0))
    y = jax.lax.conv_general_dilated(
        basis, w_hwio, window_strides=(1, 1), padding=padding,
        dimension_numbers=("NHWC", "HWIO", "NHWC"))
    _, h_out, w_out, _ = y.shape
    if out_order == "chw":
        y = jnp.transpose(y, (0, 3, 1, 2))
    return y.reshape(d_in, h_out * w_out * cout), (h_out, w_out)


def conv_bias_flat(b, h_out, w_out, out_order="hwc"):
    """Conv bias (1, Cout) broadcast into the flattened output layout."""
    if out_order == "chw":
        return jnp.repeat(b, h_out * w_out, axis=1)
    return jnp.tile(b, (1, h_out * w_out))


def build_cnn_fused_params(p, H, W, Cin, lane_multiple=_LANE,
                           weight_dtype=jnp.float32):
    """Whole CNN branch (3 convs + 3-layer head) as one padded Linear chain.
    Valid while spatial dims stay tiny (dense conv matrix grows as (HWC)^2)."""
    m1, (h1, w1) = conv_as_matrix(p["wc1"], H, W, "SAME", "hwc")
    m2, (h2, w2) = conv_as_matrix(p["wc2"], h1, w1, "SAME", "hwc")
    m3, (h3, w3) = conv_as_matrix(p["wc3"], h2, w2, "VALID", "chw")
    b1 = conv_bias_flat(p["bc1"], h1, w1, "hwc")
    b2 = conv_bias_flat(p["bc2"], h2, w2, "hwc")
    b3 = conv_bias_flat(p["bc3"], h3, w3, "chw")
    ws = [m1, m2, m3, p["wl1"], p["wl2"], p["wl3"]]
    bs = [b1, b2, b3, p["bl1"], p["bl2"], p["bl3"]]
    return pad_linear_chain(ws, bs, lane_multiple, weight_dtype=weight_dtype)


# ---------------------------------------------------------------------------
# Forward passes (each branch = exactly one pallas_call)
# ---------------------------------------------------------------------------
def cnn_value_forward(x, fused_ws, fused_bs, row_tile=None):
    """ValueNet forward, CNN branch.  x: NHWC (N, H, W, Cin)."""
    N = x.shape[0]
    x_flat = x.reshape(N, -1)  # HWC-major flatten; matches the conv matrices
    return fused_mlp_pallas(x_flat, fused_ws, fused_bs, final_act=False,
                            row_tile=row_tile, out_features=1)


def mlp_value_forward(x, fused_ws, fused_bs, row_tile=None):
    """ValueNet forward, MLP branch.  x: (B, state_dim)."""
    return fused_mlp_pallas(x, fused_ws, fused_bs, final_act=False,
                            row_tile=row_tile, out_features=1)


# ---------------------------------------------------------------------------
# Deterministic parameter init (PyTorch-style uniform(-1/sqrt(fan_in), ...))
# ---------------------------------------------------------------------------
def _linear_params(key, fan_in, fan_out):
    k1, k2 = jax.random.split(key)
    bound = 1.0 / np.sqrt(fan_in)
    w = jax.random.uniform(k1, (fan_in, fan_out), jnp.float32, -bound, bound)
    b = jax.random.uniform(k2, (1, fan_out), jnp.float32, -bound, bound)
    return w, b


def _conv_params(key, cin, cout, k):
    k1, k2 = jax.random.split(key)
    bound = 1.0 / np.sqrt(cin * k * k)
    w = jax.random.uniform(k1, (cout, cin, k, k), jnp.float32, -bound, bound)
    b = jax.random.uniform(k2, (1, cout), jnp.float32, -bound, bound)
    return w, b


# ---------------------------------------------------------------------------
# Pure-JAX references (for correctness checking against unpadded params)
# ---------------------------------------------------------------------------
def _mlp_ref(x, ws, bs):
    h = x
    n = len(ws)
    for i in range(n):
        h = h @ ws[i] + bs[i]
        if i < n - 1:
            h = _leaky(h)
    return h


def _conv2d_ref(x, w_torch, b, padding):
    w_hwio = jnp.transpose(w_torch, (2, 3, 1, 0))
    y = jax.lax.conv_general_dilated(
        x, w_hwio, window_strides=(1, 1), padding=padding,
        dimension_numbers=("NHWC", "HWIO", "NHWC"))
    return y + b.reshape(1, 1, 1, -1)


def _cnn_ref(x, p):
    h = _leaky(_conv2d_ref(x, p["wc1"], p["bc1"], "SAME"))
    h = _leaky(_conv2d_ref(h, p["wc2"], p["bc2"], "SAME"))
    h = _leaky(_conv2d_ref(h, p["wc3"], p["bc3"], "VALID"))
    N = h.shape[0]
    flat = jnp.transpose(h, (0, 3, 1, 2)).reshape(N, -1)   # torch Flatten (NCHW)
    return _mlp_ref(flat, [p["wl1"], p["wl2"], p["wl3"]],
                    [p["bl1"], p["bl2"], p["bl3"]])


# ---------------------------------------------------------------------------
if __name__ == "__main__":
    hidden = 32
    root = jax.random.PRNGKey(0)
    k_mlp, k_cnn, k_xm, k_xc, k_xm2 = jax.random.split(root, 5)

    # ---------------- MLP branch: state_dim = (16,) ----------------
    state_dim = 16
    dims = [state_dim] + [hidden] * 5 + [1]
    kms = jax.random.split(k_mlp, 6)
    mlp_w, mlp_b = [], []
    for i in range(6):
        w, b = _linear_params(kms[i], dims[i], dims[i + 1])
        mlp_w.append(w)
        mlp_b.append(b)
    mlp_wp, mlp_bp = pad_linear_chain(mlp_w, mlp_b)

    # small batch (single block, zero grid overhead)
    x_mlp = jax.random.normal(k_xm, (32, state_dim), jnp.float32)
    v_mlp = jax.block_until_ready(mlp_value_forward(x_mlp, mlp_wp, mlp_bp))
    v_mlp_ref = _mlp_ref(x_mlp, mlp_w, mlp_b)
    assert v_mlp.shape == (32, 1)
    np.testing.assert_allclose(np.asarray(v_mlp), np.asarray(v_mlp_ref),
                               rtol=1e-4, atol=1e-4)

    # mid batch (>=2 parallel tiles + ragged last tile path)
    x_big = jax.random.normal(k_xm2, (300, state_dim), jnp.float32)
    v_big = jax.block_until_ready(mlp_value_forward(x_big, mlp_wp, mlp_bp))
    v_big_ref = _mlp_ref(x_big, mlp_w, mlp_b)
    assert v_big.shape == (300, 1)
    np.testing.assert_allclose(np.asarray(v_big), np.asarray(v_big_ref),
                               rtol=1e-4, atol=1e-4)

    # bf16-weight path (pre-cast once at setup; f32 accumulate) - numerics
    # intentionally looser, so only shape/finiteness are checked here.
    mlp_wp16, mlp_bp16 = pad_linear_chain(mlp_w, mlp_b,
                                          weight_dtype=jnp.bfloat16)
    v_bf16 = jax.block_until_ready(mlp_value_forward(x_big, mlp_wp16, mlp_bp16))
    assert v_bf16.shape == (300, 1)
    assert np.all(np.isfinite(np.asarray(v_bf16)))

    # ---------------- CNN branch: state_dim = (5, 4, 3), batch = 2 ----------------
    H, W, Cin = 5, 4, 3  # (H-2)*(W-2) == 6 so Flatten -> 25*3*2 = 150
    kcs = jax.random.split(k_cnn, 6)
    p = {}
    p["wc1"], p["bc1"] = _conv_params(kcs[0], Cin, 25, 5)
    p["wc2"], p["bc2"] = _conv_params(kcs[1], 25, 25, 3)
    p["wc3"], p["bc3"] = _conv_params(kcs[2], 25, 25, 3)
    p["wl1"], p["bl1"] = _linear_params(kcs[3], 25 * 3 * 2, hidden)
    p["wl2"], p["bl2"] = _linear_params(kcs[4], hidden, hidden)
    p["wl3"], p["bl3"] = _linear_params(kcs[5], hidden, 1)

    cnn_wp, cnn_bp = build_cnn_fused_params(p, H, W, Cin)

    x_cnn = jax.random.normal(k_xc, (2, H, W, Cin), jnp.float32)
    v_cnn = jax.block_until_ready(cnn_value_forward(x_cnn, cnn_wp, cnn_bp))
    v_cnn_ref = _cnn_ref(x_cnn, p)
    assert v_cnn.shape == (2, 1)
    np.testing.assert_allclose(np.asarray(v_cnn), np.asarray(v_cnn_ref),
                               rtol=1e-4, atol=1e-4)

    print("KERNEL_OK")
</pallas_src>

<mosaic_0001>
module attributes {stable_mosaic.version = 11 : i64} {
  func.func @_probe(%arg0: i32, %arg1: memref<8x128xf32, #tpu.memory_space<vmem>>, %arg2: memref<8x128xf32, #tpu.memory_space<vmem>>, %arg3: memref<8x128xf32, #tpu.memory_space<vmem>>) attributes {dimension_semantics = [#tpu.dimension_semantics<arbitrary>], iteration_bounds = array<i64: 2>, scalar_prefetch = 0 : i64, scratch_operands = 0 : i64, tpu.core_type = #tpu.core_type<tc>, window_params = [{pipeline_mode = #tpu.pipeline_mode<synchronous>, transform_indices = @transform_0, window_bounds = array<i64: 8, 128>}, {pipeline_mode = #tpu.pipeline_mode<synchronous>, transform_indices = @transform_1, window_bounds = array<i64: 8, 128>}, {pipeline_mode = #tpu.pipeline_mode<synchronous>, transform_indices = @transform_2, window_bounds = array<i64: 8, 128>}]} {
    %c0 = arith.constant 0 : index
    %c0_0 = arith.constant 0 : index
    %0 = vector.load %arg1[%c0, %c0_0] : memref<8x128xf32, #tpu.memory_space<vmem>>, vector<8x128xf32>
    %c0_1 = arith.constant 0 : index
    %c0_2 = arith.constant 0 : index
    %1 = vector.load %arg2[%c0_1, %c0_2] : memref<8x128xf32, #tpu.memory_space<vmem>>, vector<8x128xf32>
    %2 = arith.addf %0, %1 : vector<8x128xf32>
    %c0_3 = arith.constant 0 : index
    %c0_4 = arith.constant 0 : index
    %3 = vector.load %arg3[%c0_3, %c0_4] : memref<8x128xf32, #tpu.memory_space<vmem>>, vector<8x128xf32>
    tpu.vector_store %arg3[%c0_3, %c0_4], %2 {strides = array<i32>} : memref<8x128xf32, #tpu.memory_space<vmem>>, vector<8x128xf32>,
    return
  }
  func.func @transform_0(%arg0: i32) -> (i32, i32) {
    %c0_i32 = arith.constant 0 : i32
    %c0_i32_0 = arith.constant 0 : i32
    %c0_i32_1 = arith.constant 0 : i32
    return %c0_i32, %c0_i32_0 : i32, i32
  }
  func.func @transform_1(%arg0: i32) -> (i32, i32) {
    %c0_i32 = arith.constant 0 : i32
    %c0_i32_0 = arith.constant 0 : i32
    %c0_i32_1 = arith.constant 0 : i32
    return %c0_i32, %c0_i32_0 : i32, i32
  }
  func.func @transform_2(%arg0: i32) -> (i32, i32) {
    %c0_i32 = arith.constant 0 : i32
    %c0_i32_0 = arith.constant 0 : i32
    %c0_i32_1 = arith.constant 0 : i32
    return %c0_i32, %c0_i32_0 : i32, i32
  }
}

module attributes {stable_mosaic.version = 11 : i64} {
  func.func @kernel(%arg0: i32, %arg1: memref<32x16xf32, #tpu.memory_space<vmem>>, %arg2: memref<16x128xf32, #tpu.memory_space<vmem>>, %arg3: memref<1x128xf32, #tpu.memory_space<vmem>>, %arg4: memref<128x128xf32, #tpu.memory_space<vmem>>, %arg5: memref<1x128xf32, #tpu.memory_space<vmem>>, %arg6: memref<128x128xf32, #tpu.memory_space<vmem>>, %arg7: memref<1x128xf32, #tpu.memory_space<vmem>>, %arg8: memref<128x128xf32, #tpu.memory_space<vmem>>, %arg9: memref<1x128xf32, #tpu.memory_space<vmem>>, %arg10: memref<128x128xf32, #tpu.memory_space<vmem>>, %arg11: memref<1x128xf32, #tpu.memory_space<vmem>>, %arg12: memref<128x128xf32, #tpu.memory_space<vmem>>, %arg13: memref<1x128xf32, #tpu.memory_space<vmem>>, %arg14: memref<32x128xf32, #tpu.memory_space<vmem>>) attributes {dimension_semantics = [#tpu.dimension_semantics<parallel>], iteration_bounds = array<i64: 1>, scalar_prefetch = 0 : i64, scratch_operands = 0 : i64, tpu.core_type = #tpu.core_type<tc>, window_params = [{transform_indices = @transform_0, window_bounds = array<i64: 32, 16>}, {pipeline_mode = #tpu.pipeline_mode<synchronous>, transform_indices = @transform_1, window_bounds = array<i64: 16, 128>}, {pipeline_mode = #tpu.pipeline_mode<synchronous>, transform_indices = @transform_2, window_bounds = array<i64: 1, 128>}, {pipeline_mode = #tpu.pipeline_mode<synchronous>, transform_indices = @transform_3, window_bounds = array<i64: 128, 128>}, {pipeline_mode = #tpu.pipeline_mode<synchronous>, transform_indices = @transform_4, window_bounds = array<i64: 1, 128>}, {pipeline_mode = #tpu.pipeline_mode<synchronous>, transform_indices = @transform_5, window_bounds = array<i64: 128, 128>}, {pipeline_mode = #tpu.pipeline_mode<synchronous>, transform_indices = @transform_6, window_bounds = array<i64: 1, 128>}, {pipeline_mode = #tpu.pipeline_mode<synchronous>, transform_indices = @transform_7, window_bounds = array<i64: 128, 128>}, {pipeline_mode = #tpu.pipeline_mode<synchronous>, transform_indices = @transform_8, window_bounds = array<i64: 1, 128>}, {pipeline_mode = #tpu.pipeline_mode<synchronous>, transform_indices = @transform_9, window_bounds = array<i64: 128, 128>}, {pipeline_mode = #tpu.pipeline_mode<synchronous>, transform_indices = @transform_10, window_bounds = array<i64: 1, 128>}, {pipeline_mode = #tpu.pipeline_mode<synchronous>, transform_indices = @transform_11, window_bounds = array<i64: 128, 128>}, {pipeline_mode = #tpu.pipeline_mode<synchronous>, transform_indices = @transform_12, window_bounds = array<i64: 1, 128>}, {transform_indices = @transform_13, window_bounds = array<i64: 32, 128>}]} {
    %c0 = arith.constant 0 : index
    %c0_0 = arith.constant 0 : index
    %0 = vector.load %arg1[%c0, %c0_0] : memref<32x16xf32, #tpu.memory_space<vmem>>, vector<32x16xf32>
    %c0_1 = arith.constant 0 : index
    %c0_2 = arith.constant 0 : index
    %1 = vector.load %arg2[%c0_1, %c0_2] : memref<16x128xf32, #tpu.memory_space<vmem>>, vector<16x128xf32>
    %c0_3 = arith.constant 0 : index
    %c0_4 = arith.constant 0 : index
    %2 = vector.load %arg3[%c0_3, %c0_4] : memref<1x128xf32, #tpu.memory_space<vmem>>, vector<1x128xf32>
    %cst = arith.constant dense<0.000000e+00> : vector<32x128xf32>
    %3 = tpu.matmul %0, %1, %cst {dimension_numbers = #tpu.dot_dimension_numbers<[1], [0], [0], [1], [0, 0, 1, 1], [], []>} : vector<32x16xf32>, vector<16x128xf32>, vector<32x128xf32> -> vector<32x128xf32>
    %4 = vector.broadcast %2 : vector<1x128xf32> to vector<32x128xf32>
    %5 = arith.addf %3, %4 : vector<32x128xf32>
    %cst_5 = arith.constant 0.000000e+00 : f32
    %6 = vector.broadcast %cst_5 : f32 to vector<32x128xf32>
    %7 = arith.cmpf ogt, %5, %6 : vector<32x128xf32>
    %cst_6 = arith.constant 0.00999999977 : f32
    %8 = vector.broadcast %cst_6 : f32 to vector<32x128xf32>
    %9 = arith.mulf %8, %5 : vector<32x128xf32>
    %10 = arith.select %7, %5, %9 : vector<32x128xi1>, vector<32x128xf32>
    %c0_7 = arith.constant 0 : index
    %c0_8 = arith.constant 0 : index
    %11 = vector.load %arg4[%c0_7, %c0_8] : memref<128x128xf32, #tpu.memory_space<vmem>>, vector<128x128xf32>
    %c0_9 = arith.constant 0 : index
    %c0_10 = arith.constant 0 : index
    %12 = vector.load %arg5[%c0_9, %c0_10] : memref<1x128xf32, #tpu.memory_space<vmem>>, vector<1x128xf32>
    %cst_11 = arith.constant dense<0.000000e+00> : vector<32x128xf32>
    %13 = tpu.matmul %10, %11, %cst_11 {dimension_numbers = #tpu.dot_dimension_numbers<[1], [0], [0], [1], [0, 0, 1, 1], [], []>} : vector<32x128xf32>, vector<128x128xf32>, vector<32x128xf32> -> vector<32x128xf32>
    %14 = vector.broadcast %12 : vector<1x128xf32> to vector<32x128xf32>
    %15 = arith.addf %13, %14 : vector<32x128xf32>
    %cst_12 = arith.constant 0.000000e+00 : f32
    %16 = vector.broadcast %cst_12 : f32 to vector<32x128xf32>
    %17 = arith.cmpf ogt, %15, %16 : vector<32x128xf32>
    %cst_13 = arith.constant 0.00999999977 : f32
    %18 = vector.broadcast %cst_13 : f32 to vector<32x128xf32>
    %19 = arith.mulf %18, %15 : vector<32x128xf32>
    %20 = arith.select %17, %15, %19 : vector<32x128xi1>, vector<32x128xf32>
    %c0_14 = arith.constant 0 : index
    %c0_15 = arith.constant 0 : index
    %21 = vector.load %arg6[%c0_14, %c0_15] : memref<128x128xf32, #tpu.memory_space<vmem>>, vector<128x128xf32>
    %c0_16 = arith.constant 0 : index
    %c0_17 = arith.constant 0 : index
    %22 = vector.load %arg7[%c0_16, %c0_17] : memref<1x128xf32, #tpu.memory_space<vmem>>, vector<1x128xf32>
    %cst_18 = arith.constant dense<0.000000e+00> : vector<32x128xf32>
    %23 = tpu.matmul %20, %21, %cst_18 {dimension_numbers = #tpu.dot_dimension_numbers<[1], [0], [0], [1], [0, 0, 1, 1], [], []>} : vector<32x128xf32>, vector<128x128xf32>, vector<32x128xf32> -> vector<32x128xf32>
    %24 = vector.broadcast %22 : vector<1x128xf32> to vector<32x128xf32>
    %25 = arith.addf %23, %24 : vector<32x128xf32>
    %cst_19 = arith.constant 0.000000e+00 : f32
    %26 = vector.broadcast %cst_19 : f32 to vector<32x128xf32>
    %27 = arith.cmpf ogt, %25, %26 : vector<32x128xf32>
    %cst_20 = arith.constant 0.00999999977 : f32
    %28 = vector.broadcast %cst_20 : f32 to vector<32x128xf32>
    %29 = arith.mulf %28, %25 : vector<32x128xf32>
    %30 = arith.select %27, %25, %29 : vector<32x128xi1>, vector<32x128xf32>
    %c0_21 = arith.constant 0 : index
    %c0_22 = arith.constant 0 : index
    %31 = vector.load %arg8[%c0_21, %c0_22] : memref<128x128xf32, #tpu.memory_space<vmem>>, vector<128x128xf32>
    %c0_23 = arith.constant 0 : index
    %c0_24 = arith.constant 0 : index
    %32 = vector.load %arg9[%c0_23, %c0_24] : memref<1x128xf32, #tpu.memory_space<vmem>>, vector<1x128xf32>
    %cst_25 = arith.constant dense<0.000000e+00> : vector<32x128xf32>
    %33 = tpu.matmul %30, %31, %cst_25 {dimension_numbers = #tpu.dot_dimension_numbers<[1], [0], [0], [1], [0, 0, 1, 1], [], []>} : vector<32x128xf32>, vector<128x128xf32>, vector<32x128xf32> -> vector<32x128xf32>
    %34 = vector.broadcast %32 : vector<1x128xf32> to vector<32x128xf32>
    %35 = arith.addf %33, %34 : vector<32x128xf32>
    %cst_26 = arith.constant 0.000000e+00 : f32
    %36 = vector.broadcast %cst_26 : f32 to vector<32x128xf32>
    %37 = arith.cmpf ogt, %35, %36 : vector<32x128xf32>
    %cst_27 = arith.constant 0.00999999977 : f32
    %38 = vector.broadcast %cst_27 : f32 to vector<32x128xf32>
    %39 = arith.mulf %38, %35 : vector<32x128xf32>
    %40 = arith.select %37, %35, %39 : vector<32x128xi1>, vector<32x128xf32>
    %c0_28 = arith.constant 0 : index
    %c0_29 = arith.constant 0 : index
    %41 = vector.load %arg10[%c0_28, %c0_29] : memref<128x128xf32, #tpu.memory_space<vmem>>, vector<128x128xf32>
    %c0_30 = arith.constant 0 : index
    %c0_31 = arith.constant 0 : index
    %42 = vector.load %arg11[%c0_30, %c0_31] : memref<1x128xf32, #tpu.memory_space<vmem>>, vector<1x128xf32>
    %cst_32 = arith.constant dense<0.000000e+00> : vector<32x128xf32>
    %43 = tpu.matmul %40, %41, %cst_32 {dimension_numbers = #tpu.dot_dimension_numbers<[1], [0], [0], [1], [0, 0, 1, 1], [], []>} : vector<32x128xf32>, vector<128x128xf32>, vector<32x128xf32> -> vector<32x128xf32>
    %44 = vector.broadcast %42 : vector<1x128xf32> to vector<32x128xf32>
    %45 = arith.addf %43, %44 : vector<32x128xf32>
    %cst_33 = arith.constant 0.000000e+00 : f32
    %46 = vector.broadcast %cst_33 : f32 to vector<32x128xf32>
    %47 = arith.cmpf ogt, %45, %46 : vector<32x128xf32>
    %cst_34 = arith.constant 0.00999999977 : f32
    %48 = vector.broadcast %cst_34 : f32 to vector<32x128xf32>
    %49 = arith.mulf %48, %45 : vector<32x128xf32>
    %50 = arith.select %47, %45, %49 : vector<32x128xi1>, vector<32x128xf32>
    %c0_35 = arith.constant 0 : index
    %c0_36 = arith.constant 0 : index
    %51 = vector.load %arg12[%c0_35, %c0_36] : memref<128x128xf32, #tpu.memory_space<vmem>>, vector<128x128xf32>
    %c0_37 = arith.constant 0 : index
    %c0_38 = arith.constant 0 : index
    %52 = vector.load %arg13[%c0_37, %c0_38] : memref<1x128xf32, #tpu.memory_space<vmem>>, vector<1x128xf32>
    %cst_39 = arith.constant dense<0.000000e+00> : vector<32x128xf32>
    %53 = tpu.matmul %50, %51, %cst_39 {dimension_numbers = #tpu.dot_dimension_numbers<[1], [0], [0], [1], [0, 0, 1, 1], [], []>} : vector<32x128xf32>, vector<128x128xf32>, vector<32x128xf32> -> vector<32x128xf32>
    %54 = vector.broadcast %52 : vector<1x128xf32> to vector<32x128xf32>
    %55 = arith.addf %53, %54 : vector<32x128xf32>
    %c0_40 = arith.constant 0 : index
    %c0_41 = arith.constant 0 : index
    %56 = vector.load %arg14[%c0_40, %c0_41] : memref<32x128xf32, #tpu.memory_space<vmem>>, vector<32x128xf32>
    tpu.vector_store %arg14[%c0_40, %c0_41], %55 {strides = array<i32>} : memref<32x128xf32, #tpu.memory_space<vmem>>, vector<32x128xf32>,
    return
  }
  func.func @transform_0(%arg0: i32) -> (i32, i32) {
    %c0_i32 = arith.constant 0 : i32
    %c0_i32_0 = arith.constant 0 : i32
    return %arg0, %c0_i32 : i32, i32
  }
  func.func @transform_1(%arg0: i32) -> (i32, i32) {
    %c0_i32 = arith.constant 0 : i32
    %c0_i32_0 = arith.constant 0 : i32
    %c0_i32_1 = arith.constant 0 : i32
    return %c0_i32, %c0_i32_0 : i32, i32
  }
  func.func @transform_2(%arg0: i32) -> (i32, i32) {
    %c0_i32 = arith.constant 0 : i32
    %c0_i32_0 = arith.constant 0 : i32
    %c0_i32_1 = arith.constant 0 : i32
    return %c0_i32, %c0_i32_0 : i32, i32
  }
  func.func @transform_3(%arg0: i32) -> (i32, i32) {
    %c0_i32 = arith.constant 0 : i32
    %c0_i32_0 = arith.constant 0 : i32
    %c0_i32_1 = arith.constant 0 : i32
    return %c0_i32, %c0_i32_0 : i32, i32
  }
  func.func @transform_4(%arg0: i32) -> (i32, i32) {
    %c0_i32 = arith.constant 0 : i32
    %c0_i32_0 = arith.constant 0 : i32
    %c0_i32_1 = arith.constant 0 : i32
    return %c0_i32, %c0_i32_0 : i32, i32
  }
  func.func @transform_5(%arg0: i32) -> (i32, i32) {
    %c0_i32 = arith.constant 0 : i32
    %c0_i32_0 = arith.constant 0 : i32
    %c0_i32_1 = arith.constant 0 : i32
    return %c0_i32, %c0_i32_0 : i32, i32
  }
  func.func @transform_6(%arg0: i32) -> (i32, i32) {
    %c0_i32 = arith.constant 0 : i32
    %c0_i32_0 = arith.constant 0 : i32
    %c0_i32_1 = arith.constant 0 : i32
    return %c0_i32, %c0_i32_0 : i32, i32
  }
  func.func @transform_7(%arg0: i32) -> (i32, i32) {
    %c0_i32 = arith.constant 0 : i32
    %c0_i32_0 = arith.constant 0 : i32
    %c0_i32_1 = arith.constant 0 : i32
    return %c0_i32, %c0_i32_0 : i32, i32
  }
  func.func @transform_8(%arg0: i32) -> (i32, i32) {
    %c0_i32 = arith.constant 0 : i32
    %c0_i32_0 = arith.constant 0 : i32
    %c0_i32_1 = arith.constant 0 : i32
    return %c0_i32, %c0_i32_0 : i32, i32
  }
  func.func @transform_9(%arg0: i32) -> (i32, i32) {
    %c0_i32 = arith.constant 0 : i32
    %c0_i32_0 = arith.constant 0 : i32
    %c0_i32_1 = arith.constant 0 : i32
    return %c0_i32, %c0_i32_0 : i32, i32
  }
  func.func @transform_10(%arg0: i32) -> (i32, i32) {
    %c0_i32 = arith.constant 0 : i32
    %c0_i32_0 = arith.constant 0 : i32
    %c0_i32_1 = arith.constant 0 : i32
    return %c0_i32, %c0_i32_0 : i32, i32
  }
  func.func @transform_11(%arg0: i32) -> (i32, i32) {
    %c0_i32 = arith.constant 0 : i32
    %c0_i32_0 = arith.constant 0 : i32
    %c0_i32_1 = arith.constant 0 : i32
    return %c0_i32, %c0_i32_0 : i32, i32
  }
  func.func @transform_12(%arg0: i32) -> (i32, i32) {
    %c0_i32 = arith.constant 0 : i32
    %c0_i32_0 = arith.constant 0 : i32
    %c0_i32_1 = arith.constant 0 : i32
    return %c0_i32, %c0_i32_0 : i32, i32
  }
  func.func @transform_13(%arg0: i32) -> (i32, i32) {
    %c0_i32 = arith.constant 0 : i32
    %c0_i32_0 = arith.constant 0 : i32
    return %arg0, %c0_i32 : i32, i32
  }
}

</mosaic_0001>

<bundles_post_ra>
// kernel: tpu_custom_call.1
= control target key start
LH: loop header
LB: loop body
LE: loop exit
PB: predicated region body
PF: predicated region fallthrough
CT: control target
= control target key end

     0   :  { %7 = vsyncpa [#allocation3], 0  ;;  %s431_s0 = inlined_call_operand.hbm [shape: f32[8,128], index: 0, kind: input, shape index: {}]   ;;  %s432_s1 = inlined_call_operand.hbm [shape: f32[8,128], index: 1, kind: input, shape index: {}]   ;;  %s433_s2 = inlined_call_operand.hbm [shape: f32[8,128], index: 2, kind: output, shape index: {}]  }
   0x1   :  { %8 = vsyncpa [#allocation6], 0 }
   0x2   :  { %9 = vsyncpa [#allocation4], 0  ;;  %s357_s9 = smov 0  }
   0x3 LB: > { %s196_s10 = sadd.s32 4294967295, %s337_s9   ;;  %p197_p0 = scmp.ge.s32.totalorder %s337_s9, 1  ;;  %s337_s9 = sphi %s357_s9, %s15_s9  }
   0x4   : > { %p83_p1 = scmp.lt.s32.totalorder %s337_s9, 3  ;;  %p367_p2 = scmp.eq.s32.totalorder %s196_s10, 0 }
   0x5   : > { %s339_s13 = smov [#allocation2]   ;;  %s340_s15 = smov [#allocation5]  }
   0x6   : > { %s437_s11 = scalar_select %p367_p2, 1, 0 }
   0x7   : > { %p371_p3 = pnand %p197_p0, %p83_p1  ;;  %s96_s14 = sshll.u32 %s339_s13, 4  ;;  %s97_s14 = int_to_ptr.vmem [resolvable:$true] %s96_s14 }
   0x8   : > { %s107_s16 = sshll.u32 %s340_s15, 4  ;;  %s254_s18 = scalar_lea.vmem %s97_s14, 128  ;;  %s108_s16 = int_to_ptr.vmem [resolvable:$true] %s107_s16 }
   0x9   : > { %s438_s12 = scalar_select %p371_p3, 1, 0 }
   0xa   : > { %p219_p4 = pneg %p371_p3  ;;  %p255_p7 = scmp.ne.s32.totalorder %s97_s14, %s254_s18 }
   0xb   : > { %p262_p10 = scmp.lt.s32.totalorder %s97_s14, %s97_s14  ;;  %p263_p11 = scmp.lt.s32.totalorder %s254_s18, %s254_s18 }
   0xc   : > { %p379_p5 = pnand %p367_p2, %p219_p4 }
   0xd   : > { %p264_p12 = por %p263_p11, %p262_p10 }
   0xe   : > { %p245_p6 = pneg %p379_p5 }
  0x10   : > { %p257_p8 = pnand %p255_p7, %p245_p6 }
  0x12   : > { %p258_p9 = pneg %p257_p8 }
  0x14   : > { %p265_p13 = pnand %p264_p12, %p258_p9 }
  0x16   : > { %268 = shalt.err (!%p265_p13)
}
  0x17   : > { %222 = dma.hbm_to_vmem [thread:$0]  (!%p379_p5), %s431_s0, 128, %s97_s14, [#allocation3]  }
  0x18   : > { %s280_s21 = scalar_lea.vmem %s108_s16, 128  ;;  %p288_p7 = scmp.lt.s32.totalorder %s108_s16, %s108_s16 }
  0x19   : > { %p281_p0 = scmp.ne.s32.totalorder %s108_s16, %s280_s21  ;;  %p289_p8 = scmp.lt.s32.totalorder %s280_s21, %s280_s21 }
  0x1b   : > { %p283_p1 = pnand %p281_p0, %p245_p6  ;;  %p290_p2 = por %p289_p8, %p288_p7 }
  0x1d   : > { %p284_p4 = pneg %p283_p1 }
  0x1f   : > { %p291_p3 = pnand %p290_p2, %p284_p4 }
  0x21   : > { %294 = shalt.err (!%p291_p3)
}
  0x22   : > { %225 = dma.hbm_to_vmem [thread:$0]  (!%p379_p5), %s432_s1, 128, %s108_s16, [#allocation6]  }
  0x23   : > { %p440_p9 = scmp.ne.s32.totalorder %s438_s12, 0 }
  0x24   : > { %p441_p10 = scmp.ne.s32.totalorder (!%p440_p9), %s437_s11, 0 }
  0x25   : > { %120 = sbr.rel (%p440_p9) target bundleno = 60 (0x3c), region = 28 }
  0x2a   : > { %324 = dma.done.wait (%p441_p10), [#allocation3], 128  }
  0x2b   : > { %326 = vsyncadd (%p441_p10), [#allocation3], 4294967168 }
  0x2c   : > { %328 = dma.done.wait (%p441_p10), [#allocation6], 128  }
  0x2d   : > { %330 = vsyncadd (%p441_p10), [#allocation6], 4294967168  ;;  %s341_s24 = smov [#allocation7]   ;;  %v136_v0 = vld [vmem:[#allocation2] sm:$0xff]  ;;  %v137_v1 = vld [vmem:[#allocation5] sm:$0xff]  ;;  %p413_p2 = scmp.eq.s32.totalorder %s196_s10, 1 }
  0x2e   : > { %s147_s25 = sshll.u32 %s341_s24, 4  ;;  %v138_v2 = vadd.f32 %v137_v1, %v136_v0  ;;  %s148_s25 = int_to_ptr.vmem [resolvable:$true] %s147_s25 }
  0x2f   : > { %s295_s27 = scalar_lea.vmem %s148_s25, 128  ;;  %p302_p11 = scmp.lt.s32.totalorder %s148_s25, %s148_s25 }
  0x30   : > { %139 = vst [vmem:[#allocation7] sm:$0xff] %v138_v2  ;;  %p296_p3 = scmp.ne.s32.totalorder %s148_s25, %s295_s27  ;;  %p303_p12 = scmp.lt.s32.totalorder %s295_s27, %s295_s27 }
  0x32   : > { %p297_p5 = pnand %p296_p3, %p413_p2  ;;  %p304_p13 = por %p303_p12, %p302_p11 }
  0x34   : > { %p298_p6 = pneg %p297_p5 }
  0x36   : > { %p305_p0 = pnand %p304_p13, %p298_p6 }
  0x38   : > { %308 = shalt.err (!%p305_p0)
}
  0x39   : > { %216 = dma.vmem_to_hbm [thread:$0]  (%p413_p2), %s148_s25, 128, %s433_s2, [#allocation4]  }
  0x3a   : > { %332 = dma.done.wait (%p413_p2), [#allocation4], 128  }
  0x3b   : > { %334 = vsyncadd (%p413_p2), [#allocation4], 4294967168 }
  0x3c PF: > { %s15_s9 = sadd.s32 1, %s337_s9  }
  0x3d   : > { %p12_p1 = scmp.ge.s32.totalorder %s15_s9, 4  }
  0x3f   :  { %14 = sbr.rel (!%p12_p1) target bundleno = 3 (0x3), region = 61 }
  0x44   :  { %160 = vsyncpa [#allocation3], 1 }
  0x45   :  { %162 = vsyncpa [#allocation3 + $0x1], 1 }
  0x46   :  { %163 = vsyncpa [#allocation6], 1 }
  0x47   :  { %164 = vsyncpa [#allocation4], 1 }
  0x48   :  { %166 = vsyncpa [#allocation4 + $0x1], 1 }

// kernel: tpu_custom_call.1
= control target key start
LH: loop header
LB: loop body
LE: loop exit
PB: predicated region body
PF: predicated region fallthrough
CT: control target
= control target key end

     0   :  { %18 = vsyncpa [#allocation3], 0  ;;  %s1453_s0 = inlined_call_operand.vmem [shape: f32[32,16], index: 0, kind: input, shape index: {}]   ;;  %s1454_s1 = inlined_call_operand.vmem [shape: f32[16,128], index: 1, kind: input, shape index: {}]   ;;  %s1455_s2 = inlined_call_operand.vmem [shape: f32[1,128], index: 2, kind: input, shape index: {}]   ;;  %s1456_s3 = inlined_call_operand.hbm [shape: f32[128,128], index: 3, kind: input, shape index: {}]   ;;  %s1457_s4 = inlined_call_operand.vmem [shape: f32[1,128], index: 4, kind: input, shape index: {}]   ;;  %s1458_s5 = inlined_call_operand.hbm [shape: f32[128,128], index: 5, kind: input, shape index: {}]   ;;  %s1459_s6 = inlined_call_operand.vmem [shape: f32[1,128], index: 6, kind: input, shape index: {}]   ;;  %s1460_s7 = inlined_call_operand.hbm [shape: f32[128,128], index: 7, kind: input, shape index: {}]   ;;  %s1461_s8 = inlined_call_operand.vmem [shape: f32[1,128], index: 8, kind: input, shape index: {}]   ;;  %s1462_s9 = inlined_call_operand.hbm [shape: f32[128,128], index: 9, kind: input, shape index: {}]   ;;  %s1463_s10 = inlined_call_operand.vmem [shape: f32[1,128], index: 10, kind: input, shape index: {}]   ;;  %s1464_s11 = inlined_call_operand.hbm [shape: f32[128,128], index: 11, kind: input, shape index: {}]   ;;  %s1465_s12 = inlined_call_operand.vmem [shape: f32[1,128], index: 12, kind: input, shape index: {}]   ;;  %s1466_s13 = inlined_call_operand.hbm [shape: f32[32,128], index: 13, kind: output, shape index: {}]  }
   0x1   :  { %19 = vsyncpa [#allocation6], 0 }
   0x2   :  { %20 = vsyncpa [#allocation9], 0 }
   0x3   :  { %21 = vsyncpa [#allocation4], 0  ;;  %s1299_s25 = smov [#allocation5]   ;;  %s1300_s27 = smov [#allocation8]  }
   0x4   :  { %s47_s26 = sshll.u32 %s1299_s25, 4  ;;  %s75_s28 = sshll.u32 %s1300_s27, 4  ;;  %s48_s26 = int_to_ptr.vmem [resolvable:$true] %s47_s26  ;;  %s76_s28 = int_to_ptr.vmem [resolvable:$true] %s75_s28 }
   0x5   :  { %s1179_s29 = scalar_lea.vmem %s48_s26, 2048  ;;  %p1184_p1 = scmp.lt.s32.totalorder %s48_s26, %s48_s26 }
   0x6   :  { %p1180_p0 = scmp.ne.s32.totalorder %s48_s26, %s1179_s29  ;;  %p1185_p2 = scmp.lt.s32.totalorder %s1179_s29, %s1179_s29 }
   0x8   :  { %p1186_p3 = por %p1185_p2, %p1184_p1 }
   0xa   :  { %p1187_p4 = pnand %p1186_p3, %p1180_p0 }
   0xc   :  { %1190 = shalt.err (!%p1187_p4)
}
   0xd   :  { %s1301_s30 = smov 128   ;;  %s1302_s14 = smov 8  }
   0xe   :  { %53 = dma.hbm_to_vmem [thread:$0]  %s1458_s5, 2048, %s48_s26, [#allocation6], %s1301_s30, %s1301_s30, %s1302_s14  }
   0xf   :  { %s1199_s17 = scalar_lea.vmem %s76_s28, 2048  ;;  %p1204_p6 = scmp.lt.s32.totalorder %s76_s28, %s76_s28 }
  0x10   :  { %p1200_p5 = scmp.ne.s32.totalorder %s76_s28, %s1199_s17  ;;  %p1205_p7 = scmp.lt.s32.totalorder %s1199_s17, %s1199_s17 }
  0x12   :  { %p1206_p8 = por %p1205_p7, %p1204_p6 }
  0x14   :  { %p1207_p9 = pnand %p1206_p8, %p1200_p5 }
  0x16   :  { %1210 = shalt.err (!%p1207_p9)
}
  0x17   :  { %81 = dma.hbm_to_vmem [thread:$0]  %s1462_s9, 2048, %s76_s28, [#allocation9], %s1301_s30, %s1301_s30, %s1302_s14  }
  0x18   :  { %s1303_s20 = smov [#allocation2]   ;;  %s1304_s22 = smov [#allocation7]  }
  0x19   :  { %s33_s21 = sshll.u32 %s1303_s20, 4  ;;  %s61_s23 = sshll.u32 %s1304_s22, 4  ;;  %s34_s21 = int_to_ptr.vmem [resolvable:$true] %s33_s21  ;;  %s62_s23 = int_to_ptr.vmem [resolvable:$true] %s61_s23 }
  0x1a   :  { %s1219_s5 = scalar_lea.vmem %s34_s21, 2048  ;;  %p1224_p11 = scmp.lt.s32.totalorder %s34_s21, %s34_s21 }
  0x1b   :  { %p1220_p10 = scmp.ne.s32.totalorder %s34_s21, %s1219_s5  ;;  %p1225_p12 = scmp.lt.s32.totalorder %s1219_s5, %s1219_s5 }
  0x1d   :  { %p1226_p13 = por %p1225_p12, %p1224_p11 }
  0x1f   :  { %p1227_p0 = pnand %p1226_p13, %p1220_p10 }
  0x21   :  { %1230 = shalt.err (!%p1227_p0)
}
  0x22   :  { %39 = dma.hbm_to_vmem [thread:$0]  %s1456_s3, 2048, %s34_s21, [#allocation3], %s1301_s30, %s1301_s30, %s1302_s14  }
  0x23   :  { %s1239_s9 = scalar_lea.vmem %s62_s23, 2048  ;;  %p1244_p2 = scmp.lt.s32.totalorder %s62_s23, %s62_s23 }
  0x24   :  { %p1240_p1 = scmp.ne.s32.totalorder %s62_s23, %s1239_s9  ;;  %p1245_p3 = scmp.lt.s32.totalorder %s1239_s9, %s1239_s9 }
  0x26   :  { %p1246_p4 = por %p1245_p3, %p1244_p2 }
  0x28   :  { %p1247_p5 = pnand %p1246_p4, %p1240_p1 }
  0x2a   :  { %1250 = shalt.err (!%p1247_p5)
}
  0x2b   :  { %67 = dma.hbm_to_vmem [thread:$0]  %s1460_s7, 2048, %s62_s23, [#allocation6], %s1301_s30, %s1301_s30, %s1302_s14  }
  0x2c   :  { %s1305_s28 = smov [#allocation10]  }
  0x2d   :  { %s89_s29 = sshll.u32 %s1305_s28, 4  ;;  %s90_s29 = int_to_ptr.vmem [resolvable:$true] %s89_s29 }
  0x2e   :  { %s1259_s15 = scalar_lea.vmem %s90_s29, 2048  ;;  %p1264_p7 = scmp.lt.s32.totalorder %s90_s29, %s90_s29 }
  0x2f   :  { %p1260_p6 = scmp.ne.s32.totalorder %s90_s29, %s1259_s15  ;;  %p1265_p8 = scmp.lt.s32.totalorder %s1259_s15, %s1259_s15 }
  0x31   :  { %p1266_p9 = por %p1265_p8, %p1264_p7 }
  0x33   :  { %p1267_p10 = pnand %p1266_p9, %p1260_p6 }
  0x35   :  { %1270 = shalt.err (!%p1267_p10)
}
  0x36   :  { %95 = dma.hbm_to_vmem [thread:$0]  %s1464_s11, 2048, %s90_s29, [#allocation9], %s1301_s30, %s1301_s30, %s1302_s14  }
  0x37   :  { %1291 = dma.done.wait [#allocation3], 2048  }
  0x38   :  { %1292 = vsyncadd [#allocation3], 4294965248 }
  0x39   :  { %1293 = dma.done.wait [#allocation6], 4096  }
  0x3a   :  { %1294 = vsyncadd [#allocation6], 4294963200 }
  0x3b   :  { %1295 = dma.done.wait [#allocation9], 4096  }
  0x3c   :  { %1296 = vsyncadd [#allocation9], 4294963200  ;;  %vm126_vm0 = vcmask 130048   ;;  %v118_v0 = vld [vmem:[%s1454_s1 + $0x8] sm:$0xff]  ;;  %v117_v1 = vld [vmem:[%s1454_s1] sm:$0xff]  ;;  %s1306_s15 = smov [#allocation11]  }
  0x3d   :  { %v113_v2 = vld [vmem:[%s1453_s0] sm:$0xff]  ;;  %963 = vmatprep.subr.mxu0 %v118_v0  ;;  %v114_v3 = vld [vmem:[%s1453_s0 + $0x8] sm:$0xff]  ;;  %v251_v4 = vld [vmem:[#allocation2 + $0x78] sm:$0xff]  ;;  %s833_s3 = sshll.u32 %s1306_s15, 4  ;;  %s834_s3 = int_to_ptr.vmem [resolvable:$true] %s833_s3 }
  0x3e   :  { %967 = vmatprep.mubr.msk.f32.mxu0 %vm126_vm0, %v113_v2  ;;  %964 = vmatpush3.msra.mxu0 %v118_v0  ;;  %v250_v5 = vld [vmem:[#allocation2 + $0x70] sm:$0xff]  ;;  %v249_v7 = vld [vmem:[#allocation2 + $0x68] sm:$0xff]  ;;  %v116_v8 = vld [vmem:[%s1453_s0 + $0x18] sm:$0xff]  ;;  %s1271_s16 = scalar_lea.vmem %s834_s3, 512  ;;  %p1276_p12 = scmp.lt.s32.totalorder %s834_s3, %s834_s3 }
  0x3f   :  { %965 = vmatprep.subr.mxu0 %v117_v1  ;;  %v115_v6 = vld [vmem:[%s1453_s0 + $0x10] sm:$0xff]  ;;  %973 = vmatprep.subr.mxu1 %v251_v4  ;;  %v248_v9 = vld [vmem:[#allocation2 + $0x60] sm:$0xff]  ;;  %v247_v10 = vld [vmem:[#allocation2 + $0x58] sm:$0xff]  ;;  %p1272_p11 = scmp.ne.s32.totalorder %s834_s3, %s1271_s16  ;;  %p1277_p13 = scmp.lt.s32.totalorder %s1271_s16, %s1271_s16 }
  0x40   :  { %966 = vmatpush3.msra.mxu0 %v117_v1  ;;  %974 = vmatpush3.msra.mxu1 %v251_v4  ;;  %v246_v11 = vld [vmem:[#allocation2 + $0x50] sm:$0xff]  ;;  %v245_v12 = vld [vmem:[#allocation2 + $0x48] sm:$0xff]  ;;  %v244_v13 = vld [vmem:[#allocation2 + $0x40] sm:$0xff] }
  0x41   :  { %968 = vmatmul.mubr.msk.f32.vlgmr.msra.gmra.mxu0 %vm126_vm0, %v114_v3  ;;  %975 = vmatprep.subr.mxu1 %v250_v5  ;;  %v243_v14 = vld [vmem:[#allocation2 + $0x38] sm:$0xff]  ;;  %v242_v15 = vld [vmem:[#allocation2 + $0x30] sm:$0xff]  ;;  %v241_v16 = vld [vmem:[#allocation2 + $0x28] sm:$0xff]  ;;  %p1278_p0 = por %p1277_p13, %p1276_p12 }
  0x42   :  { %970 = vmatprep.mubr.msk.f32.mxu0 %vm126_vm0, %v115_v6  ;;  %976 = vmatpush3.msra.mxu1 %v250_v5  ;;  %v240_v17 = vld [vmem:[#allocation2 + $0x20] sm:$0xff]  ;;  %v239_v18 = vld [vmem:[#allocation2 + $0x18] sm:$0xff]  ;;  %v238_v19 = vld [vmem:[#allocation2 + $0x10] sm:$0xff] }
  0x43   :  { %977 = vmatprep.subr.mxu1 %v249_v7  ;;  %v237_v20 = vld [vmem:[#allocation2 + $0x8] sm:$0xff]  ;;  %v236_v21 = vld [vmem:[#allocation2] sm:$0xff]  ;;  %v371_v22 = vld [vmem:[#allocation5 + $0x78] sm:$0xff]  ;;  %p1279_p1 = pnand %p1278_p0, %p1272_p11 }
  0x44   :  { %978 = vmatpush3.msra.mxu1 %v249_v7  ;;  %v370_v23 = vld [vmem:[#allocation5 + $0x70] sm:$0xff]  ;;  %1011 = vmatprep.subr.mxu0 %v371_v22  ;;  %v369_v24 = vld [vmem:[#allocation5 + $0x68] sm:$0xff]  ;;  %v368_v25 = vld [vmem:[#allocation5 + $0x60] sm:$0xff] }
  0x45   :  { %971 = vmatmul.mubr.msk.f32.gmra.mxu0 %vm126_vm0, %v116_v8  ;;  %979 = vmatprep.subr.mxu1 %v248_v9  ;;  %v367_v26 = vld [vmem:[#allocation5 + $0x58] sm:$0xff]  ;;  %v366_v27 = vld [vmem:[#allocation5 + $0x50] sm:$0xff]  ;;  %v365_v28 = vld [vmem:[#allocation5 + $0x48] sm:$0xff] }
  0x46   :  { %980 = vmatpush3.msra.mxu1 %v248_v9  ;;  %1012 = vmatpush3.msra.mxu0 %v371_v22  ;;  %v364_v29 = vld [vmem:[#allocation5 + $0x40] sm:$0xff]  ;;  %v363_v30 = vld [vmem:[#allocation5 + $0x38] sm:$0xff]  ;;  %v362_v31 = vld [vmem:[#allocation5 + $0x30] sm:$0xff] }
  0x47   :  { %981 = vmatprep.subr.mxu1 %v247_v10  ;;  %1013 = vmatprep.subr.mxu0 %v370_v23  ;;  %v361_v32 = vld [vmem:[#allocation5 + $0x28] sm:$0xff]  ;;  %v360_v33 = vld [vmem:[#allocation5 + $0x20] sm:$0xff]  ;;  %v359_v51 = vld [vmem:[#allocation5 + $0x18] sm:$0xff] }
  0x48   :  { %982 = vmatpush3.msra.mxu1 %v247_v10  ;;  %1014 = vmatpush3.msra.mxu0 %v370_v23  ;;  %v847_v34 = vld [vmem:[%s1455_s2] ss:$0 sm:$0xff]  ;;  %v358_v52 = vld [vmem:[#allocation5 + $0x10] sm:$0xff]  ;;  %v357_v53 = vld [vmem:[#allocation5 + $0x8] sm:$0xff] }
  0x49   :  { %983 = vmatprep.subr.mxu1 %v246_v11  ;;  %1015 = vmatprep.subr.mxu0 %v369_v24  ;;  %v356_v54 = vld [vmem:[#allocation5] sm:$0xff]  ;;  %v491_v55 = vld [vmem:[#allocation7 + $0x78] sm:$0xff]  ;;  %v490_v56 = vld [vmem:[#allocation7 + $0x70] sm:$0xff] }
  0x4a   :  { %984 = vmatpush3.msra.mxu1 %v246_v11  ;;  %1016 = vmatpush3.msra.mxu0 %v369_v24  ;;  %v489_v57 = vld [vmem:[#allocation7 + $0x68] sm:$0xff]  ;;  %v488_v58 = vld [vmem:[#allocation7 + $0x60] sm:$0xff]  ;;  %v487_v59 = vld [vmem:[#allocation7 + $0x58] sm:$0xff] }
  0x4b   :  { %985 = vmatprep.subr.mxu1 %v245_v12  ;;  %1017 = vmatprep.subr.mxu0 %v368_v25  ;;  %v486_v60 = vld [vmem:[#allocation7 + $0x50] sm:$0xff]  ;;  %v485_v61 = vld [vmem:[#allocation7 + $0x48] sm:$0xff]  ;;  %v484_v62 = vld [vmem:[#allocation7 + $0x40] sm:$0xff] }
  0x4c   :  { %986 = vmatpush3.msra.mxu1 %v245_v12  ;;  %1018 = vmatpush3.msra.mxu0 %v368_v25  ;;  %v483_v63 = vld [vmem:[#allocation7 + $0x38] sm:$0xff]  ;;  %v482_v0 = vld [vmem:[#allocation7 + $0x30] sm:$0xff]  ;;  %v481_v1 = vld [vmem:[#allocation7 + $0x28] sm:$0xff] }
  0x4d   :  { %987 = vmatprep.subr.mxu1 %v244_v13  ;;  %1019 = vmatprep.subr.mxu0 %v367_v26  ;;  %v480_v2 = vld [vmem:[#allocation7 + $0x20] sm:$0xff]  ;;  %v477_v22 = vld [vmem:[#allocation7 + $0x8] sm:$0xff]  ;;  %v611_v24 = vld [vmem:[#allocation8 + $0x78] sm:$0xff] }
  0x4e   :  { %988 = vmatpush3.msra.mxu1 %v244_v13  ;;  %1020 = vmatpush3.msra.mxu0 %v367_v26  ;;  %v852_v3 = vld [vmem:[%s1457_s4] ss:$0 sm:$0xff]  ;;  %v610_v25 = vld [vmem:[#allocation8 + $0x70] sm:$0xff]  ;;  %v609_v26 = vld [vmem:[#allocation8 + $0x68] sm:$0xff] }
  0x4f   :  { %989 = vmatprep.subr.mxu1 %v243_v14  ;;  %1021 = vmatprep.subr.mxu0 %v366_v27  ;;  %v476_v23 = vld [vmem:[#allocation7] sm:$0xff] }
  0x50   :  { %990 = vmatpush3.msra.mxu1 %v243_v14  ;;  %1022 = vmatpush3.msra.mxu0 %v366_v27  ;;  %v608_v27 = vld [vmem:[#allocation8 + $0x60] sm:$0xff] }
  0x51   :  { %991 = vmatprep.subr.mxu1 %v242_v15  ;;  %1023 = vmatprep.subr.mxu0 %v365_v28 }
  0x52   :  { %992 = vmatpush3.msra.mxu1 %v242_v15  ;;  %1024 = vmatpush3.msra.mxu0 %v365_v28  ;;  %v607_v28 = vld [vmem:[#allocation8 + $0x58] sm:$0xff] }
  0x53   :  { %993 = vmatprep.subr.mxu1 %v241_v16  ;;  %1025 = vmatprep.subr.mxu0 %v364_v29 }
  0x54   :  { %994 = vmatpush3.msra.mxu1 %v241_v16  ;;  %1026 = vmatpush3.msra.mxu0 %v364_v29  ;;  %v606_v29 = vld [vmem:[#allocation8 + $0x50] sm:$0xff] }
  0x55   :  { %995 = vmatprep.subr.mxu1 %v240_v17  ;;  %1027 = vmatprep.subr.mxu0 %v363_v30 }
  0x56   :  { %996 = vmatpush3.msra.mxu1 %v240_v17  ;;  %1028 = vmatpush3.msra.mxu0 %v363_v30  ;;  %v605_v30 = vld [vmem:[#allocation8 + $0x48] sm:$0xff] }
  0x57   :  { %997 = vmatprep.subr.mxu1 %v239_v18  ;;  %1029 = vmatprep.subr.mxu0 %v362_v31 }
  0x58   :  { %998 = vmatpush3.msra.mxu1 %v239_v18  ;;  %1030 = vmatpush3.msra.mxu0 %v362_v31  ;;  %v604_v31 = vld [vmem:[#allocation8 + $0x40] sm:$0xff] }
  0x59   :  { %999 = vmatprep.subr.mxu1 %v238_v19  ;;  %1031 = vmatprep.subr.mxu0 %v361_v32 }
  0x5a   :  { %1000 = vmatpush3.msra.mxu1 %v238_v19  ;;  %1032 = vmatpush3.msra.mxu0 %v361_v32  ;;  %v603_v32 = vld [vmem:[#allocation8 + $0x38] sm:$0xff] }
  0x5b   :  { %1001 = vmatprep.subr.mxu1 %v237_v20  ;;  %1033 = vmatprep.subr.mxu0 %v360_v33 }
  0x5c   :  { %1002 = vmatpush3.msra.mxu1 %v237_v20  ;;  %1034 = vmatpush3.msra.mxu0 %v360_v33  ;;  %v479_v20 = vld [vmem:[#allocation7 + $0x18] sm:$0xff]  ;;  %v602_v33 = vld [vmem:[#allocation8 + $0x30] sm:$0xff] }
  0x5d   :  { %1003 = vmatprep.subr.mxu1 %v236_v21  ;;  %1035 = vmatprep.subr.mxu0 %v359_v51 }
  0x5e   :  { %1004 = vmatpush3.msra.mxu1 %v236_v21  ;;  %1036 = vmatpush3.msra.mxu0 %v359_v51  ;;  %v478_v21 = vld [vmem:[#allocation7 + $0x10] sm:$0xff] }
  0x5f   :  { %1037 = vmatprep.subr.mxu0 %v358_v52  ;;  %1049 = vmatprep.subr.mxu1 %v491_v55 }
  0x60   :  { %1038 = vmatpush3.msra.mxu0 %v358_v52 }
  0x61   :  { %1039 = vmatprep.subr.mxu0 %v357_v53 }
  0x62   :  { %1040 = vmatpush3.msra.mxu0 %v357_v53  ;;  %v599_v53 = vld [vmem:[#allocation8 + $0x18] sm:$0xff] }
  0x63   :  { %1041 = vmatprep.subr.mxu0 %v356_v54 }
  0x64   :  { %1042 = vmatpush3.msra.mxu0 %v356_v54  ;;  %v598_v54 = vld [vmem:[#allocation8 + $0x10] sm:$0xff] }
  0x65   :  { %1087 = vmatprep.subr.mxu0 %v611_v24 }
 0x101   :  { %v969_v35 = vpop.f32.mrf.mxu0 }
 0x102   :  { %v211_v36 = vadd.f32 %v969_v35, %v847_v34  ;;  %v600_v35 = vld [vmem:[#allocation8 + $0x20] sm:$0xff] }
 0x103   :  { %v205_v37 = vpop.f32.mrf.mxu0 }
 0x104   :  { %v206_v38 = vadd.f32 %v847_v34, %v205_v37  ;;  %v229_v39 = vmul.f32 0.01, %v211_v36  ;;  %vm225_vm2 = vcmp.gt.f32.partialorder %v211_v36, 0.0 }
 0x105   :  { %v972_v40 = vpop.f32.mrf.mxu0 }
 0x106   :  { %v221_v41 = vadd.f32 %v972_v40, %v847_v34  ;;  %vm224_vm1 = vcmp.gt.f32.partialorder %v206_v38, 0.0  ;;  %v228_v42 = vmul.f32 0.01, %v206_v38  ;;  %v233_v47 = vsel %vm225_vm2, %v211_v36, %v229_v39  ;;  %v853_v36 = vld [vmem:[%s1459_s6] ss:$0 sm:$0xff] }
 0x107   :  { %v215_v43 = vpop.f32.mrf.mxu0 }
 0x108   :  { %v216_v44 = vadd.f32 %v847_v34, %v215_v43  ;;  %v232_v45 = vsel %vm224_vm1, %v206_v38, %v228_v42  ;;  %v231_v46 = vmul.f32 0.01, %v221_v41  ;;  %vm227_vm4 = vcmp.gt.f32.partialorder %v221_v41, 0.0  ;;  %v601_v34 = vld [vmem:[#allocation8 + $0x28] sm:$0xff] }
 0x109   :  { %1005 = vmatprep.mubr.f32.mxu1 %v232_v45 }
 0x10a   :  { %v230_v48 = vmul.f32 0.01, %v216_v44  ;;  %1006 = vmatmul.mubr.f32.vlgmr.msra.gmra.mxu1 %v233_v47  ;;  %vm226_vm3 = vcmp.gt.f32.partialorder %v216_v44, 0.0  ;;  %v235_v50 = vsel %vm227_vm4, %v221_v41, %v231_v46 }
 0x10b   :  { %1050 = vmatpush3.msra.mxu1 %v491_v55  ;;  %v597_v55 = vld [vmem:[#allocation8 + $0x8] sm:$0xff] }
 0x10c   :  { %v234_v49 = vsel %vm226_vm3, %v216_v44, %v230_v48  ;;  %1051 = vmatprep.subr.mxu1 %v490_v56 }
 0x10d   :  { %1008 = vmatprep.mubr.f32.mxu1 %v234_v49  ;;  %1052 = vmatpush3.msra.mxu1 %v490_v56  ;;  %v596_v56 = vld [vmem:[#allocation8] sm:$0xff] }
 0x10e   :  { %1009 = vmatmul.mubr.f32.gmra.mxu1 %v235_v50  ;;  %1053 = vmatprep.subr.mxu1 %v489_v57 }
 0x10f   :  { %1054 = vmatpush3.msra.mxu1 %v489_v57  ;;  %v731_v57 = vld [vmem:[#allocation10 + $0x78] sm:$0xff] }
 0x110   :  { %1055 = vmatprep.subr.mxu1 %v488_v58 }
 0x111   :  { %1056 = vmatpush3.msra.mxu1 %v488_v58  ;;  %v730_v58 = vld [vmem:[#allocation10 + $0x70] sm:$0xff] }
 0x112   :  { %1057 = vmatprep.subr.mxu1 %v487_v59 }
 0x113   :  { %1058 = vmatpush3.msra.mxu1 %v487_v59  ;;  %v729_v59 = vld [vmem:[#allocation10 + $0x68] sm:$0xff] }
 0x114   :  { %1059 = vmatprep.subr.mxu1 %v486_v60 }
 0x115   :  { %1060 = vmatpush3.msra.mxu1 %v486_v60  ;;  %v728_v60 = vld [vmem:[#allocation10 + $0x60] sm:$0xff] }
 0x116   :  { %1061 = vmatprep.subr.mxu1 %v485_v61 }
 0x117   :  { %1062 = vmatpush3.msra.mxu1 %v485_v61  ;;  %v727_v61 = vld [vmem:[#allocation10 + $0x58] sm:$0xff] }
 0x118   :  { %1063 = vmatprep.subr.mxu1 %v484_v62 }
 0x119   :  { %1064 = vmatpush3.msra.mxu1 %v484_v62  ;;  %v726_v62 = vld [vmem:[#allocation10 + $0x50] sm:$0xff] }
 0x11a   :  { %1065 = vmatprep.subr.mxu1 %v483_v63 }
 0x11b   :  { %1066 = vmatpush3.msra.mxu1 %v483_v63  ;;  %v725_v63 = vld [vmem:[#allocation10 + $0x48] sm:$0xff] }
 0x11c   :  { %1067 = vmatprep.subr.mxu1 %v482_v0 }
 0x11d   :  { %1068 = vmatpush3.msra.mxu1 %v482_v0  ;;  %v724_v0 = vld [vmem:[#allocation10 + $0x40] sm:$0xff] }
 0x11e   :  { %1069 = vmatprep.subr.mxu1 %v481_v1 }
 0x11f   :  { %1070 = vmatpush3.msra.mxu1 %v481_v1  ;;  %v723_v1 = vld [vmem:[#allocation10 + $0x38] sm:$0xff] }
 0x120   :  { %1071 = vmatprep.subr.mxu1 %v480_v2 }
 0x121   :  { %1072 = vmatpush3.msra.mxu1 %v480_v2  ;;  %v722_v2 = vld [vmem:[#allocation10 + $0x30] sm:$0xff] }
 0x122   :  { %1073 = vmatprep.subr.mxu1 %v479_v20 }
 0x123   :  { %1074 = vmatpush3.msra.mxu1 %v479_v20 }
 0x124   :  { %1075 = vmatprep.subr.mxu1 %v478_v21 }
 0x125   :  { %1076 = vmatpush3.msra.mxu1 %v478_v21 }
 0x126   :  { %1077 = vmatprep.subr.mxu1 %v477_v22 }
 0x127   :  { %1078 = vmatpush3.msra.mxu1 %v477_v22  ;;  %v719_v22 = vld [vmem:[#allocation10 + $0x18] sm:$0xff] }
 0x128   :  { %1079 = vmatprep.subr.mxu1 %v476_v23 }
 0x129   :  { %1080 = vmatpush3.msra.mxu1 %v476_v23  ;;  %v718_v23 = vld [vmem:[#allocation10 + $0x10] sm:$0xff] }
 0x12a   :  { %1125 = vmatprep.subr.mxu1 %v731_v57 }
 0x1ca   :  { %v1007_v4 = vpop.f32.mrf.mxu1 }
 0x1cb   :  { %v331_v5 = vadd.f32 %v1007_v4, %v852_v3  ;;  %v720_v4 = vld [vmem:[#allocation10 + $0x20] sm:$0xff] }
 0x1cc   :  { %v325_v6 = vpop.f32.mrf.mxu1 }
 0x1cd   :  { %v326_v7 = vadd.f32 %v852_v3, %v325_v6  ;;  %v349_v8 = vmul.f32 0.01, %v331_v5  ;;  %vm345_vm5 = vcmp.gt.f32.partialorder %v331_v5, 0.0 }
 0x1ce   :  { %v1010_v9 = vpop.f32.mrf.mxu1 }
 0x1cf   :  { %v348_v10 = vmul.f32 0.01, %v326_v7  ;;  %v341_v11 = vadd.f32 %v1010_v9, %v852_v3  ;;  %vm344_vm6 = vcmp.gt.f32.partialorder %v326_v7, 0.0  ;;  %v353_v15 = vsel %vm345_vm5, %v331_v5, %v349_v8  ;;  %v854_v5 = vld [vmem:[%s1461_s8] ss:$0 sm:$0xff] }
 0x1d0   :  { %v335_v12 = vpop.f32.mrf.mxu1 }
 0x1d1   :  { %v336_v13 = vadd.f32 %v852_v3, %v335_v12  ;;  %v352_v14 = vsel %vm344_vm6, %v326_v7, %v348_v10  ;;  %v351_v16 = vmul.f32 0.01, %v341_v11  ;;  %vm347_vm8 = vcmp.gt.f32.partialorder %v341_v11, 0.0  ;;  %v721_v3 = vld [vmem:[#allocation10 + $0x28] sm:$0xff] }
 0x1d2   :  { %1043 = vmatprep.mubr.f32.mxu0 %v352_v14 }
 0x1d3   :  { %v350_v17 = vmul.f32 0.01, %v336_v13  ;;  %1044 = vmatmul.mubr.f32.vlgmr.msra.gmra.mxu0 %v353_v15  ;;  %vm346_vm7 = vcmp.gt.f32.partialorder %v336_v13, 0.0  ;;  %v355_v19 = vsel %vm347_vm8, %v341_v11, %v351_v16 }
 0x1d4   :  { %1088 = vmatpush3.msra.mxu0 %v611_v24  ;;  %v717_v24 = vld [vmem:[#allocation10 + $0x8] sm:$0xff] }
 0x1d5   :  { %v354_v18 = vsel %vm346_vm7, %v336_v13, %v350_v17  ;;  %1089 = vmatprep.subr.mxu0 %v610_v25 }
 0x1d6   :  { %1046 = vmatprep.mubr.f32.mxu0 %v354_v18  ;;  %1090 = vmatpush3.msra.mxu0 %v610_v25  ;;  %v716_v25 = vld [vmem:[#allocation10] sm:$0xff] }
 0x1d7   :  { %1047 = vmatmul.mubr.f32.gmra.mxu0 %v355_v19  ;;  %1091 = vmatprep.subr.mxu0 %v609_v26 }
 0x1d8   :  { %1092 = vmatpush3.msra.mxu0 %v609_v26  ;;  %v855_v26 = vld [vmem:[%s1463_s10] ss:$0 sm:$0xff] }
 0x1d9   :  { %1093 = vmatprep.subr.mxu0 %v608_v27 }
 0x1da   :  { %1094 = vmatpush3.msra.mxu0 %v608_v27 }
 0x1db   :  { %1095 = vmatprep.subr.mxu0 %v607_v28 }
 0x1dc   :  { %1096 = vmatpush3.msra.mxu0 %v607_v28 }
 0x1dd   :  { %1097 = vmatprep.subr.mxu0 %v606_v29 }
 0x1de   :  { %1098 = vmatpush3.msra.mxu0 %v606_v29 }
 0x1df   :  { %1099 = vmatprep.subr.mxu0 %v605_v30 }
 0x1e0   :  { %1100 = vmatpush3.msra.mxu0 %v605_v30 }
 0x1e1   :  { %1101 = vmatprep.subr.mxu0 %v604_v31 }
 0x1e2   :  { %1102 = vmatpush3.msra.mxu0 %v604_v31 }
 0x1e3   :  { %1103 = vmatprep.subr.mxu0 %v603_v32 }
 0x1e4   :  { %1104 = vmatpush3.msra.mxu0 %v603_v32 }
 0x1e5   :  { %1105 = vmatprep.subr.mxu0 %v602_v33 }
 0x1e6   :  { %1106 = vmatpush3.msra.mxu0 %v602_v33 }
 0x1e7   :  { %1107 = vmatprep.subr.mxu0 %v601_v34 }
 0x1e8   :  { %1108 = vmatpush3.msra.mxu0 %v601_v34 }
 0x1e9   :  { %1109 = vmatprep.subr.mxu0 %v600_v35 }
 0x1ea   :  { %1110 = vmatpush3.msra.mxu0 %v600_v35 }
 0x1eb   :  { %1111 = vmatprep.subr.mxu0 %v599_v53 }
 0x1ec   :  { %1112 = vmatpush3.msra.mxu0 %v599_v53 }
 0x1ed   :  { %1113 = vmatprep.subr.mxu0 %v598_v54 }
 0x1ee   :  { %1114 = vmatpush3.msra.mxu0 %v598_v54 }
 0x1ef   :  { %1115 = vmatprep.subr.mxu0 %v597_v55 }
 0x1f0   :  { %1116 = vmatpush3.msra.mxu0 %v597_v55 }
 0x1f1   :  { %1117 = vmatprep.subr.mxu0 %v596_v56 }
 0x1f2   :  { %1118 = vmatpush3.msra.mxu0 %v596_v56 }
 0x293   :  { %v1045_v37 = vpop.f32.mrf.mxu0 }
 0x294   :  { %v451_v38 = vadd.f32 %v1045_v37, %v853_v36 }
 0x295   :  { %v445_v39 = vpop.f32.mrf.mxu0 }
 0x296   :  { %v446_v40 = vadd.f32 %v853_v36, %v445_v39  ;;  %v469_v41 = vmul.f32 0.01, %v451_v38  ;;  %vm465_vm9 = vcmp.gt.f32.partialorder %v451_v38, 0.0 }
 0x297   :  { %v1048_v42 = vpop.f32.mrf.mxu0 }
 0x298   :  { %v468_v43 = vmul.f32 0.01, %v446_v40  ;;  %v461_v44 = vadd.f32 %v1048_v42, %v853_v36  ;;  %vm464_vm10 = vcmp.gt.f32.partialorder %v446_v40, 0.0  ;;  %v473_v48 = vsel %vm465_vm9, %v451_v38, %v469_v41 }
 0x299   :  { %v455_v45 = vpop.f32.mrf.mxu0 }
 0x29a   :  { %v456_v46 = vadd.f32 %v853_v36, %v455_v45  ;;  %v472_v47 = vsel %vm464_vm10, %v446_v40, %v468_v43  ;;  %v471_v49 = vmul.f32 0.01, %v461_v44  ;;  %vm467_vm12 = vcmp.gt.f32.partialorder %v461_v44, 0.0  ;;  %v856_v43 = vld [vmem:[%s1465_s12] ss:$0 sm:$0xff] }
 0x29b   :  { %1081 = vmatprep.mubr.f32.mxu1 %v472_v47 }
 0x29c   :  { %v470_v50 = vmul.f32 0.01, %v456_v46  ;;  %1082 = vmatmul.mubr.f32.vlgmr.msra.gmra.mxu1 %v473_v48  ;;  %vm466_vm11 = vcmp.gt.f32.partialorder %v456_v46, 0.0  ;;  %v475_v52 = vsel %vm467_vm12, %v461_v44, %v471_v49 }
 0x29d   :  { %1126 = vmatpush3.msra.mxu1 %v731_v57 }
 0x29e   :  { %v474_v51 = vsel %vm466_vm11, %v456_v46, %v470_v50  ;;  %1127 = vmatprep.subr.mxu1 %v730_v58 }
 0x29f   :  { %1084 = vmatprep.mubr.f32.mxu1 %v474_v51  ;;  %1128 = vmatpush3.msra.mxu1 %v730_v58 }
 0x2a0   :  { %1085 = vmatmul.mubr.f32.gmra.mxu1 %v475_v52  ;;  %1129 = vmatprep.subr.mxu1 %v729_v59 }
 0x2a1   :  { %1130 = vmatpush3.msra.mxu1 %v729_v59 }
 0x2a2   :  { %1131 = vmatprep.subr.mxu1 %v728_v60 }
 0x2a3   :  { %1132 = vmatpush3.msra.mxu1 %v728_v60 }
 0x2a4   :  { %1133 = vmatprep.subr.mxu1 %v727_v61 }
 0x2a5   :  { %1134 = vmatpush3.msra.mxu1 %v727_v61 }
 0x2a6   :  { %1135 = vmatprep.subr.mxu1 %v726_v62 }
 0x2a7   :  { %1136 = vmatpush3.msra.mxu1 %v726_v62 }
 0x2a8   :  { %1137 = vmatprep.subr.mxu1 %v725_v63 }
 0x2a9   :  { %1138 = vmatpush3.msra.mxu1 %v725_v63 }
 0x2aa   :  { %1139 = vmatprep.subr.mxu1 %v724_v0 }
 0x2ab   :  { %1140 = vmatpush3.msra.mxu1 %v724_v0 }
 0x2ac   :  { %1141 = vmatprep.subr.mxu1 %v723_v1 }
 0x2ad   :  { %1142 = vmatpush3.msra.mxu1 %v723_v1 }
 0x2ae   :  { %1143 = vmatprep.subr.mxu1 %v722_v2 }
 0x2af   :  { %1144 = vmatpush3.msra.mxu1 %v722_v2 }
 0x2b0   :  { %1145 = vmatprep.subr.mxu1 %v721_v3 }
 0x2b1   :  { %1146 = vmatpush3.msra.mxu1 %v721_v3 }
 0x2b2   :  { %1147 = vmatprep.subr.mxu1 %v720_v4 }
 0x2b3   :  { %1148 = vmatpush3.msra.mxu1 %v720_v4 }
 0x2b4   :  { %1149 = vmatprep.subr.mxu1 %v719_v22 }
 0x2b5   :  { %1150 = vmatpush3.msra.mxu1 %v719_v22 }
 0x2b6   :  { %1151 = vmatprep.subr.mxu1 %v718_v23 }
 0x2b7   :  { %1152 = vmatpush3.msra.mxu1 %v718_v23 }
 0x2b8   :  { %1153 = vmatprep.subr.mxu1 %v717_v24 }
 0x2b9   :  { %1154 = vmatpush3.msra.mxu1 %v717_v24 }
 0x2ba   :  { %1155 = vmatprep.subr.mxu1 %v716_v25 }
 0x2bb   :  { %1156 = vmatpush3.msra.mxu1 %v716_v25 }
 0x35c   :  { %v1083_v6 = vpop.f32.mrf.mxu1 }
 0x35d   :  { %v571_v7 = vadd.f32 %v1083_v6, %v854_v5 }
 0x35e   :  { %v565_v8 = vpop.f32.mrf.mxu1 }
 0x35f   :  { %v566_v9 = vadd.f32 %v854_v5, %v565_v8  ;;  %v589_v10 = vmul.f32 0.01, %v571_v7  ;;  %vm585_vm13 = vcmp.gt.f32.partialorder %v571_v7, 0.0 }
 0x360   :  { %v1086_v11 = vpop.f32.mrf.mxu1 }
 0x361   :  { %v588_v12 = vmul.f32 0.01, %v566_v9  ;;  %v581_v13 = vadd.f32 %v1086_v11, %v854_v5  ;;  %vm584_vm14 = vcmp.gt.f32.partialorder %v566_v9, 0.0  ;;  %v593_v17 = vsel %vm585_vm13, %v571_v7, %v589_v10 }
 0x362   :  { %v575_v14 = vpop.f32.mrf.mxu1 }
 0x363   :  { %v576_v15 = vadd.f32 %v854_v5, %v575_v14  ;;  %v592_v16 = vsel %vm584_vm14, %v566_v9, %v588_v12  ;;  %v591_v18 = vmul.f32 0.01, %v581_v13  ;;  %vm587_vm0 = vcmp.gt.f32.partialorder %v581_v13, 0.0 }
 0x364   :  { %1119 = vmatprep.mubr.f32.mxu0 %v592_v16 }
 0x365   :  { %v590_v19 = vmul.f32 0.01, %v576_v15  ;;  %1120 = vmatmul.mubr.f32.vlgmr.msra.gmra.mxu0 %v593_v17  ;;  %vm586_vm15 = vcmp.gt.f32.partialorder %v576_v15, 0.0  ;;  %v595_v21 = vsel %vm587_vm0, %v581_v13, %v591_v18 }
 0x367   :  { %v594_v20 = vsel %vm586_vm15, %v576_v15, %v590_v19 }
 0x368   :  { %1122 = vmatprep.mubr.f32.mxu0 %v594_v20 }
 0x369   :  { %1123 = vmatmul.mubr.f32.gmra.mxu0 %v595_v21 }
 0x425   :  { %v1121_v27 = vpop.f32.mrf.mxu0 }
 0x426   :  { %v691_v28 = vadd.f32 %v1121_v27, %v855_v26 }
 0x427   :  { %v685_v29 = vpop.f32.mrf.mxu0 }
 0x428   :  { %v686_v30 = vadd.f32 %v855_v26, %v685_v29  ;;  %v709_v31 = vmul.f32 0.01, %v691_v28  ;;  %vm705_vm1 = vcmp.gt.f32.partialorder %v691_v28, 0.0 }
 0x429   :  { %v1124_v32 = vpop.f32.mrf.mxu0 }
 0x42a   :  { %v708_v33 = vmul.f32 0.01, %v686_v30  ;;  %v701_v34 = vadd.f32 %v1124_v32, %v855_v26  ;;  %vm704_vm2 = vcmp.gt.f32.partialorder %v686_v30, 0.0  ;;  %v713_v38 = vsel %vm705_vm1, %v691_v28, %v709_v31 }
 0x42b   :  { %v695_v35 = vpop.f32.mrf.mxu0 }
 0x42c   :  { %v696_v36 = vadd.f32 %v855_v26, %v695_v35  ;;  %v712_v37 = vsel %vm704_vm2, %v686_v30, %v708_v33  ;;  %v711_v39 = vmul.f32 0.01, %v701_v34  ;;  %vm707_vm4 = vcmp.gt.f32.partialorder %v701_v34, 0.0 }
 0x42d   :  { %1157 = vmatprep.mubr.f32.mxu1 %v712_v37 }
 0x42e   :  { %v710_v40 = vmul.f32 0.01, %v696_v36  ;;  %1158 = vmatmul.mubr.f32.vlgmr.msra.gmra.mxu1 %v713_v38  ;;  %vm706_vm3 = vcmp.gt.f32.partialorder %v696_v36, 0.0  ;;  %v715_v42 = vsel %vm707_vm4, %v701_v34, %v711_v39 }
 0x430   :  { %v714_v41 = vsel %vm706_vm3, %v696_v36, %v710_v40 }
 0x431   :  { %1160 = vmatprep.mubr.f32.mxu1 %v714_v41 }
 0x432   :  { %1161 = vmatmul.mubr.f32.gmra.mxu1 %v715_v42 }
 0x4ee   :  { %v1159_v44 = vpop.f32.mrf.mxu1 }
 0x4ef   :  { %v811_v45 = vadd.f32 %v1159_v44, %v856_v43 }
 0x4f0   :  { %v805_v46 = vpop.f32.mrf.mxu1 }
 0x4f1   :  { %825 = vst [vmem:[#allocation11 + $0x8] sm:$0xff] %v811_v45  ;;  %v806_v47 = vadd.f32 %v856_v43, %v805_v46 }
 0x4f2   :  { %v1162_v48 = vpop.f32.mrf.mxu1 }
 0x4f3   :  { %824 = vst [vmem:[#allocation11] sm:$0xff] %v806_v47  ;;  %v821_v49 = vadd.f32 %v1162_v48, %v856_v43 }
 0x4f4   :  { %v815_v50 = vpop.f32.mrf.mxu1 }
 0x4f5   :  { %827 = vst [vmem:[#allocation11 + $0x18] sm:$0xff] %v821_v49  ;;  %v816_v51 = vadd.f32 %v856_v43, %v815_v50 }
 0x4f7   :  { %826 = vst [vmem:[#allocation11 + $0x10] sm:$0xff] %v816_v51 }
 0x4f8   :  { %1282 = shalt.err (!%p1279_p1)
}
 0x4f9   :  { %839 = dma.vmem_to_hbm [thread:$0]  %s834_s3, 512, %s1466_s13, [#allocation4], %s1301_s30, %s1301_s30, %s1302_s14  }
 0x4fa   :  { %1297 = dma.done.wait [#allocation4], 512  }
 0x4fb   :  { %1298 = vsyncadd [#allocation4], 4294966784 }
 0x4fc   :  { %843 = vsyncpa [#allocation3], 1 }
 0x4fd   :  { %844 = vsyncpa [#allocation6], 1 }
 0x4fe   :  { %845 = vsyncpa [#allocation9], 1 }
 0x4ff   :  { %846 = vsyncpa [#allocation4], 1 }

</bundles_post_ra>
